<compile_context>
chip_gen: v6e
topology: v6e:2x2x1
jax: 0.10.0
libtpu: 0.0.40
codegen_flags: <defaults>
</compile_context>

<pallas_src>
import jax
import jax.numpy as jnp
import numpy as np
from jax.experimental import pallas as pl
from jax.experimental.pallas import tpu as pltpu


def _round_up(x, m):
    return -(-x // m) * m


def mtl_heads_kernel(x_ref, w_ref, b_ref, o_ref):
    # x_ref: (tb, tk)  lane-dense slab of the flattened (B, C*HW) feature map
    # w_ref: (tk, NP)  fused + pool-folded + zero-padded head weights
    # b_ref: (1, NP)   fused + zero-padded biases (f32)
    # o_ref: (tb, NP)  fused logits (f32); doubles as the k-axis accumulator
    k = pl.program_id(1)

    @pl.when(k == 0)
    def _():
        o_ref[...] = jnp.broadcast_to(b_ref[...], o_ref.shape)

    o_ref[...] += jnp.dot(x_ref[...].astype(w_ref.dtype), w_ref[...],
                          preferred_element_type=jnp.float32)


def fuse_mtl_heads(weights, biases, hw, *, weight_dtype=jnp.bfloat16):
    """Precompute fused head parameters once (hoisted out of the forward path).

    weights: list of 4 arrays (n_i, C)  -- torch nn.Linear layout
    biases:  list of 4 arrays (n_i,)
    hw:      H*W of the pre-pool feature map

    Returns (w, b, sizes):
      w: (C*hw, NP) pool-folded fused weight so x_flat @ w == mean_hw(x) @ W^T
      b: (1, NP)    fused bias (f32)
      sizes: per-head logit widths for slicing the fused output
    """
    C = int(weights[0].shape[1])
    sizes = [int(wi.shape[0]) for wi in weights]
    N = sum(sizes)
    NP = _round_up(max(N, 1), 128)          # lane-dense output width (keep at 128x)

    w_cat = jnp.concatenate([wi.T.astype(jnp.float32) for wi in weights],
                            axis=1)                                   # (C, N)
    # Fold AdaptiveAvgPool2d into the matmul: repeat each channel row hw times
    # (matching the contiguous NCHW flatten order k = c*hw + s), scale by 1/hw.
    w_exp = jnp.repeat(w_cat * (1.0 / float(hw)), hw, axis=0)          # (C*hw, N)
    w = jnp.zeros((C * hw, NP), dtype=weight_dtype).at[:, :N].set(
        w_exp.astype(weight_dtype))
    b = jnp.zeros((1, NP), dtype=jnp.float32).at[:, :N].set(
        jnp.concatenate(biases, axis=0).astype(jnp.float32)[None, :])
    return w, b, sizes


def _plan_tiles(B, K, NP, x_itemsize, w_itemsize, vmem_limit_bytes):
    """Pick (tb, tk) from an explicit VMEM byte budget."""
    budget = int(0.8 * vmem_limit_bytes)       # headroom for Pallas internals

    def block_bytes(tb, tk):
        tbp = _round_up(tb, 8)                 # sublane padding
        tkp = _round_up(tk, 128)               # lane padding
        return (2 * tbp * tkp * x_itemsize     # x tile, double-buffered
                + 2 * tkp * NP * w_itemsize    # w tile, double-buffered
                + 2 * tbp * NP * 4             # f32 out tile / accumulator
                + 2 * 8 * NP * 4)              # bias tile

    if B <= 8:
        tb_cands = [B]
    else:
        tb_cands = sorted({t for t in (8, 16, 32, 64, 128, 256) if t <= B}
                          | ({B} if B % 8 == 0 else set()))
    tk_cands = [K] + [t for t in (16384, 8192, 4096, 2048, 1024, 512, 256, 128)
                      if t < K and K % t == 0]

    feasible = [(tb, tk) for tb in tb_cands for tk in tk_cands
                if block_bytes(tb, tk) <= budget]
    if not feasible:
        # Nothing fits the requested budget; fall back to the smallest tiles
        # (caller should raise vmem_limit_bytes for exotic shapes).
        return tb_cands[0], tk_cands[-1]

    def score(cfg):
        tb, tk = cfg
        steps = -(-B // tb)
        return (min(steps, 4),   # enough grid steps to pipeline / feed both v7x TCs
                tk == K,         # prefer the weight fully VMEM-resident
                tb, tk)          # then the biggest tiles
    return max(feasible, key=score)


def mtl_forward(feat_nchw, fused_w, fused_b, sizes, *,
                tb=None, tk=None, vmem_limit_bytes=48 << 20):
    """feat_nchw: (B, C, H, W) pre-pool backbone feature map (NCHW, native dtype).
    fused_w / fused_b / sizes: output of fuse_mtl_heads (precomputed once).
    Returns a list of 4 logits arrays, each (B, n_i) -- matches MTL.forward."""
    B, C, H, W = feat_nchw.shape
    K = C * H * W
    NP = int(fused_w.shape[1])
    assert fused_w.shape[0] == K, (fused_w.shape, K)

    x = feat_nchw.reshape(B, K)                # free contiguous reshape of NCHW

    ptb, ptk = _plan_tiles(B, K, NP, x.dtype.itemsize,
                           fused_w.dtype.itemsize, vmem_limit_bytes)
    tb = ptb if tb is None else min(int(tb), B)
    tk = ptk if tk is None else int(tk)
    assert K % tk == 0, f"tk={tk} must divide C*H*W={K}"
    assert tk == K or tk % 128 == 0, f"tk={tk} must be lane-aligned (128) or full"
    assert tb == B or tb % 8 == 0, f"tb={tb} must be a multiple of 8 or equal B"
    grid = (pl.cdiv(B, tb), K // tk)

    cost = pl.CostEstimate(
        flops=2 * B * K * NP,
        transcendentals=0,
        bytes_accessed=(x.size * x.dtype.itemsize
                        + fused_w.size * fused_w.dtype.itemsize
                        + fused_b.size * 4
                        + B * NP * 4),
    )

    out = pl.pallas_call(
        mtl_heads_kernel,
        out_shape=jax.ShapeDtypeStruct((B, NP), jnp.float32),
        grid=grid,
        in_specs=[
            pl.BlockSpec((tb, tk), lambda i, k: (i, k)),    # feature slab
            pl.BlockSpec((tk, NP), lambda i, k: (k, 0)),    # fused weights
            pl.BlockSpec((1, NP), lambda i, k: (0, 0)),     # fused bias
        ],
        out_specs=pl.BlockSpec((tb, NP), lambda i, k: (i, 0)),
        compiler_params=pltpu.CompilerParams(
            dimension_semantics=("parallel", "arbitrary"),
            vmem_limit_bytes=int(vmem_limit_bytes)),
        cost_estimate=cost,
    )(x, fused_w, fused_b)

    outs, off = [], 0
    for n in sizes:
        outs.append(out[:, off:off + n])
        off += n
    return outs


def _init_linear(key, out_features, in_features):
    # deterministic nn.Linear-style init: U(-1/sqrt(fan_in), 1/sqrt(fan_in))
    kw, kb = jax.random.split(key)
    bound = 1.0 / np.sqrt(in_features)
    w = jax.random.uniform(kw, (out_features, in_features),
                           minval=-bound, maxval=bound, dtype=jnp.float32)
    b = jax.random.uniform(kb, (out_features,),
                           minval=-bound, maxval=bound, dtype=jnp.float32)
    return w, b


if __name__ == "__main__":
    key = jax.random.PRNGKey(0)

    # Small shapes consistent with the module: pre-pool feature map (B, C, H, W).
    # C stands in for resnet50's 2048; C*H*W = 2048 is lane-dense (128-multiple).
    B, C, H, W = 16, 128, 4, 4
    num_class = [5, 7, 4, 6]   # [type, school, timeframe, author]

    k_feat, k1, k2, k3, k4 = jax.random.split(key, 5)
    feat = jax.random.normal(k_feat, (B, C, H, W), dtype=jnp.float32)

    weights, biases = [], []
    for n, k in zip(num_class, (k1, k2, k3, k4)):
        wi, bi = _init_linear(k, n, C)
        weights.append(wi)
        biases.append(bi)

    # pure-JAX reference of the module's forward semantics
    pooled_ref = feat.mean(axis=(2, 3))                               # (B, C)
    refs = [pooled_ref @ wi.T + bi for wi, bi in zip(weights, biases)]

    # --- path 1: f32 fused weights, planner-chosen tiles (resident weight) ---
    w32, b32, sizes = fuse_mtl_heads(weights, biases, H * W,
                                     weight_dtype=jnp.float32)
    outs = mtl_forward(feat, w32, b32, sizes)
    outs = [jax.block_until_ready(o) for o in outs]
    for o, r, n in zip(outs, refs, num_class):
        assert o.shape == (B, n), (o.shape, (B, n))
        np.testing.assert_allclose(np.asarray(o), np.asarray(r),
                                   rtol=1e-4, atol=1e-4)

    # --- path 2: bf16 fused weights (native MXU) with forced K-streaming and
    #             a batch-tiled grid (exercises the accumulator / pipeline path)
    wb16, bb16, sizes = fuse_mtl_heads(weights, biases, H * W,
                                       weight_dtype=jnp.bfloat16)
    outs_b = mtl_forward(feat, wb16, bb16, sizes, tb=8, tk=512)   # grid = (2, 4)
    outs_b = [jax.block_until_ready(o) for o in outs_b]
    for o, r, n in zip(outs_b, refs, num_class):
        assert o.shape == (B, n), (o.shape, (B, n))
        np.testing.assert_allclose(np.asarray(o), np.asarray(r),
                                   rtol=5e-2, atol=5e-2)

    print("KERNEL_OK")
</pallas_src>

<mosaic_0001>
module attributes {stable_mosaic.version = 11 : i64} {
  func.func @mtl_heads_kernel(%arg0: i32, %arg1: i32, %arg2: memref<8x2048xf32, #tpu.memory_space<vmem>>, %arg3: memref<2048x128xf32, #tpu.memory_space<vmem>>, %arg4: memref<1x128xf32, #tpu.memory_space<vmem>>, %arg5: memref<8x128xf32, #tpu.memory_space<vmem>>) attributes {dimension_semantics = [#tpu.dimension_semantics<parallel>, #tpu.dimension_semantics<arbitrary>], iteration_bounds = array<i64: 2, 1>, scalar_prefetch = 0 : i64, scratch_operands = 0 : i64, tpu.core_type = #tpu.core_type<tc>, window_params = [{transform_indices = @transform_0, window_bounds = array<i64: 8, 2048>}, {transform_indices = @transform_1, window_bounds = array<i64: 2048, 128>}, {pipeline_mode = #tpu.pipeline_mode<synchronous>, transform_indices = @transform_2, window_bounds = array<i64: 1, 128>}, {transform_indices = @transform_3, window_bounds = array<i64: 8, 128>}]} {
    %c0_i32 = arith.constant 0 : i32
    %0 = arith.cmpi eq, %arg1, %c0_i32 : i32
    %1 = arith.extui %0 : i1 to i32
    %c0_i32_0 = arith.constant 0 : i32
    %2 = arith.cmpi ne, %1, %c0_i32_0 : i32
    scf.if %2 {
      %c0_8 = arith.constant 0 : index
      %c0_9 = arith.constant 0 : index
      %9 = vector.load %arg4[%c0_8, %c0_9] : memref<1x128xf32, #tpu.memory_space<vmem>>, vector<1x128xf32>
      %10 = vector.shape_cast %9 : vector<1x128xf32> to vector<1x128xf32>
      %11 = vector.broadcast %10 : vector<1x128xf32> to vector<8x128xf32>
      %c0_10 = arith.constant 0 : index
      %c0_11 = arith.constant 0 : index
      %12 = vector.load %arg5[%c0_10, %c0_11] : memref<8x128xf32, #tpu.memory_space<vmem>>, vector<8x128xf32>
      tpu.vector_store %arg5[%c0_10, %c0_11], %11 {strides = array<i32>} : memref<8x128xf32, #tpu.memory_space<vmem>>, vector<8x128xf32>,
    } else {
    }
    %c0 = arith.constant 0 : index
    %c0_1 = arith.constant 0 : index
    %3 = vector.load %arg5[%c0, %c0_1] : memref<8x128xf32, #tpu.memory_space<vmem>>, vector<8x128xf32>
    %c0_2 = arith.constant 0 : index
    %c0_3 = arith.constant 0 : index
    %4 = vector.load %arg2[%c0_2, %c0_3] : memref<8x2048xf32, #tpu.memory_space<vmem>>, vector<8x2048xf32>
    %c0_4 = arith.constant 0 : index
    %c0_5 = arith.constant 0 : index
    %5 = vector.load %arg3[%c0_4, %c0_5] : memref<2048x128xf32, #tpu.memory_space<vmem>>, vector<2048x128xf32>
    %cst = arith.constant dense<0.000000e+00> : vector<8x128xf32>
    %6 = tpu.matmul %4, %5, %cst {dimension_numbers = #tpu.dot_dimension_numbers<[1], [0], [0], [1], [0, 0, 1, 1], [], []>} : vector<8x2048xf32>, vector<2048x128xf32>, vector<8x128xf32> -> vector<8x128xf32>
    %7 = arith.addf %3, %6 : vector<8x128xf32>
    %c0_6 = arith.constant 0 : index
    %c0_7 = arith.constant 0 : index
    %8 = vector.load %arg5[%c0_6, %c0_7] : memref<8x128xf32, #tpu.memory_space<vmem>>, vector<8x128xf32>
    tpu.vector_store %arg5[%c0_6, %c0_7], %7 {strides = array<i32>} : memref<8x128xf32, #tpu.memory_space<vmem>>, vector<8x128xf32>,
    return
  }
  func.func @transform_0(%arg0: i32, %arg1: i32) -> (i32, i32) {
    %c0_i32 = arith.constant 0 : i32
    return %arg0, %arg1 : i32, i32
  }
  func.func @transform_1(%arg0: i32, %arg1: i32) -> (i32, i32) {
    %c0_i32 = arith.constant 0 : i32
    %c0_i32_0 = arith.constant 0 : i32
    return %arg1, %c0_i32 : i32, i32
  }
  func.func @transform_2(%arg0: i32, %arg1: i32) -> (i32, i32) {
    %c0_i32 = arith.constant 0 : i32
    %c0_i32_0 = arith.constant 0 : i32
    %c0_i32_1 = arith.constant 0 : i32
    return %c0_i32, %c0_i32_0 : i32, i32
  }
  func.func @transform_3(%arg0: i32, %arg1: i32) -> (i32, i32) {
    %c0_i32 = arith.constant 0 : i32
    %c0_i32_0 = arith.constant 0 : i32
    return %arg0, %c0_i32 : i32, i32
  }
}

</mosaic_0001>

<bundles_post_ra>
// kernel: tpu_custom_call.1
= control target key start
LH: loop header
LB: loop body
LE: loop exit
PB: predicated region body
PF: predicated region fallthrough
CT: control target
= control target key end

     0   :  { %8 = vsyncpa [#allocation3], 0  ;;  %s1909_s0 = inlined_call_operand.hbm [shape: f32[16,2048], index: 0, kind: input, shape index: {}]   ;;  %s1910_s1 = inlined_call_operand.hbm [shape: f32[2048,128], index: 1, kind: input, shape index: {}]   ;;  %s1911_s2 = inlined_call_operand.vmem [shape: f32[1,128], index: 2, kind: input, shape index: {}]   ;;  %s1912_s3 = inlined_call_operand.hbm [shape: f32[16,128], index: 3, kind: output, shape index: {}]  }
   0x1   :  { %10 = vsyncpa [#allocation3 + $0x1], 0 }
   0x2   :  { %11 = vsyncpa [#allocation6], 0 }
   0x3   :  { %12 = vsyncpa [#allocation4], 0 }
   0x4   :  { %14 = vsyncpa [#allocation4 + $0x1], 0  ;;  %s1720_s12 = smov 0   ;;  %s1722_s13 = smov 0  }
   0x5   :  { %s1724_s14 = smov 0   ;;  %s1726_s15 = smov 0  }
   0x6   :  { %s1728_s16 = smov 0   ;;  %s1730_s17 = smov 0  }
   0x7 LB: > { %s1182_s18 = sadd.s32 4294967295, %s1693_s17   ;;  %s1183_s19 = sadd.s32 4294967294, %s1693_s17   ;;  %s1693_s17 = sphi %s1730_s17, %s20_s17   ;;  %s1689_s16 = sphi %s1728_s16, %s1930_s16   ;;  %s1685_s15 = sphi %s1726_s15, %s1929_s15   ;;  %s1681_s14 = sphi %s1724_s14, %s1928_s14   ;;  %s1677_s13 = sphi %s1722_s13, %s1927_s13   ;;  %s1673_s12 = sphi %s1720_s12, %s1926_s12  }
   0x8   : > { %p54_p0 = scmp.ne.s32.totalorder %s1677_s13, %s1673_s12  ;;  %p1754_p1 = scmp.eq.s32.totalorder %s1182_s18, 0 }
   0x9   : > { %p1758_p2 = scmp.eq.s32.totalorder %s1182_s18, 1  ;;  %p131_p3 = scmp.eq.s32.totalorder %s1183_s19, 1 }
   0xa   : > { %p1764_p4 = por %p1754_p1, %p54_p0  ;;  %p1184_p5 = scmp.ge.s32.totalorder %s1693_s17, 1 }
   0xb   : > { %p1769_p6 = por %p131_p3, %p54_p0  ;;  %p138_p7 = scmp.lt.s32.totalorder %s1693_s17, 3 }
   0xc   : > { %s1916_s22 = scalar_select %p1764_p4, 1, 0 }
   0xd   : > { %s1917_s23 = scalar_select %p1769_p6, 1, 0 }
   0xe   : > { %p1774_p8 = pnand %p1184_p5, %p138_p7  ;;  %s1695_s25 = smov [#allocation5]  }
   0xf   : > { %s153_s26 = sshll.u32 %s1695_s25, 4  ;;  %s32_s28 = sadd.s32 1, %s1689_s16  ;;  %s154_s26 = int_to_ptr.vmem [resolvable:$true] %s153_s26 }
  0x10   : > { %p1488_p9 = pneg %p1774_p8  ;;  %s1566_s29 = scalar_lea.vmem %s154_s26, 32768 }
  0x11   : > { %p1567_p13 = scmp.ne.s32.totalorder %s154_s26, %s1566_s29  ;;  %p1574_p5 = scmp.lt.s32.totalorder %s154_s26, %s154_s26 }
  0x12   : > { %p1783_p11 = pnand %p1488_p9, %p1754_p1  ;;  %p1575_p7 = scmp.lt.s32.totalorder %s1566_s29, %s1566_s29 }
  0x14   : > { %p1557_p12 = pneg %p1783_p11  ;;  %p1576_p6 = por %p1575_p7, %p1574_p5 }
  0x16   : > { %p1569_p0 = pnand %p1567_p13, %p1557_p12 }
  0x18   : > { %p1570_p3 = pneg %p1569_p0 }
  0x1a   : > { %p1577_p4 = pnand %p1576_p6, %p1570_p3 }
  0x1c   : > { %1580 = shalt.err (!%p1577_p4)
}
  0x1d   : > { %s1696_s30 = smov 128   ;;  %s1697_s4 = smov 8  }
  0x1e   : > { %1491 = dma.hbm_to_vmem [thread:$0]  (!%p1783_p11), %s1910_s1, 32768, %s154_s26, [#allocation6], %s1696_s30, %s1696_s30, %s1697_s4  }
  0x1f   : > { %p34_p6 = scmp.ge.s32.totalorder %s32_s28, 2  ;;  %s41_s7 = sadd.s32 1, %s1681_s14 }
  0x20   : > { %p48_p4 = scmp.ne.s32.totalorder %s1681_s14, %s1677_s13  ;;  %p49_p9 = scmp.eq.s32.totalorder %s1693_s17, 0 }
  0x21   : > { %s1932_s28 = smov (%p34_p6, %s32_s28), 0  ;;  %p1501_p0 = scmp.lt.s32.totalorder %s1693_s17, 2 }
  0x22   : > { %p1801_p12 = por %p49_p9, %p48_p4  ;;  %p1807_p13 = por %p1758_p2, %p48_p4 }
  0x23   : > { %s36_s10 = ssub.s32 %s1689_s16, %s1932_s28  ;;  %s170_s11 = sand.u32 1, %s1681_s14  }
  0x24   : > { %p39_p11 = scmp.eq.s32.totalorder %s36_s10, 0  ;;  %s1187_s18 = sshll.u32 %s170_s11, 7 }
  0x25   : > { %s1199_s25 = sshll.u32 %s1689_s16, 11  ;;  %s174_s30 = scalar_lea.vmem [#allocation2], %s1187_s18 }
  0x26   : > { %s1816_s19 = scalar_select %p39_p11, %s1681_s14, %s41_s7  }
  0x27   : > { %s182_s29 = scalar_lea.hbm %s1909_s0, %s1199_s25  ;;  %s184_s4 = sshll.u32 %s174_s30, 4  ;;  %s185_s4 = int_to_ptr.vmem [resolvable:$true] %s184_s4 }
  0x28   : > { %p1824_p2 = pnand %p1501_p0, %p1801_p12  ;;  %s171_s5 = scalar_lea.sflag [#allocation3], %s170_s11 }
  0x29   : > { %s1594_s6 = scalar_lea.vmem %s185_s4, 2048  ;;  %s1698_s7 = smov [#allocation2]  }
  0x2a   : > { %p1583_p3 = pneg %p1824_p2  ;;  %p1595_p5 = scmp.ne.s32.totalorder %s185_s4, %s1594_s6 }
  0x2b   : > { %s1599_s10 = sshll.u32 %s1698_s7, 4  ;;  %s1600_s10 = int_to_ptr.vmem [resolvable:$false] %s1599_s10 }
  0x2c   : > { %p1597_p7 = pnand %p1595_p5, %p1583_p3  ;;  %s1601_s25 = scalar_lea.vmem %s1600_s10, 4096 }
  0x2d   : > { %p1602_p4 = scmp.lt.s32.totalorder %s185_s4, %s1600_s10  ;;  %p1603_p9 = scmp.lt.s32.totalorder %s1601_s25, %s1594_s6 }
  0x2e   : > { %p1598_p6 = pneg %p1597_p7 }
  0x2f   : > { %p1604_p11 = por %p1603_p9, %p1602_p4 }
  0x31   : > { %p1605_p10 = pnand %p1604_p11, %p1598_p6 }
  0x33   : > { %1608 = shalt.err (!%p1605_p10)
}
  0x34   : > { %1495 = dma.hbm_to_vmem [thread:$0]  (!%p1824_p2), %s182_s29, 2048, %s185_s4, %s171_s5  }
  0x35   : > { %193 = sbr.rel (%p1774_p8) target bundleno = 414 (0x19e), region = 32  ;;  %s1835_s8 = sand.u32 (!%p1774_p8), 1, %s1677_s13  }
  0x36   : > { %s1191_s11 = sshll.u32 (!%p1774_p8), %s1835_s8, 7  ;;  %s196_s18 = scalar_lea.sflag (!%p1774_p8), [#allocation3], %s1835_s8 }
  0x37   : > { %s1839_s26 = scalar_lea.vmem (!%p1774_p8), [#allocation2], %s1191_s11  ;;  %p1923_p12 = scmp.ne.s32.totalorder (!%p1774_p8), %s1916_s22, 0 }
  0x3a   : > { %1660 = dma.done.wait (%p1923_p12), %s196_s18, 2048  }
  0x3b   : > { %1662 = vsyncadd (%p1923_p12), %s196_s18, 4294965248 }
  0x3c   : > { %1664 = dma.done.wait (%p1754_p1), [#allocation6], 32768  }
  0x3d   : > { %1666 = vsyncadd (%p1754_p1), [#allocation6], 4294934528  ;;  %v288_v0 = vld [vmem:[#allocation5 + $0xf8] sm:$0xff]  ;;  %v287_v4 = vld [vmem:[#allocation5 + $0xf0] sm:$0xff]  ;;  %s1193_s20 = sshll.u32 %s1835_s8, 3  ;;  %s1196_s27 = sshll.u32 %s1685_s15, 7 }
  0x3e   : > { %v320_v1 = vld [vmem:[#allocation5 + $0x1f8] sm:$0xff]  ;;  %1200 = vmatprep.subr.mxu0 %v288_v0  ;;  %v319_v5 = vld [vmem:[#allocation5 + $0x1f0] sm:$0xff]  ;;  %v286_v8 = vld [vmem:[#allocation5 + $0xe8] sm:$0xff]  ;;  %s225_s29 = scalar_lea.vmem [#allocation7], %s1193_s20  ;;  %s1087_s5 = scalar_lea.hbm %s1912_s3, %s1196_s27 }
  0x3f   : > { %v272_v2 = vld [vmem:[#allocation5 + $0x78] sm:$0xff]  ;;  %1235 = vmatprep.subr.mxu1 %v320_v1  ;;  %v271_v6 = vld [vmem:[#allocation5 + $0x70] sm:$0xff]  ;;  %v318_v9 = vld [vmem:[#allocation5 + $0x1e8] sm:$0xff]  ;;  %s1089_s30 = sshll.u32 %s225_s29, 4  ;;  %s1076_s6 = scalar_lea.sflag [#allocation4], %s1835_s8  ;;  %s1090_s30 = int_to_ptr.vmem [resolvable:$true] %s1089_s30 }
  0x40   : > { %v304_v3 = vld [vmem:[#allocation5 + $0x178] sm:$0xff]  ;;  %1201 = vmatpush3.msra.mxu0 %v272_v2  ;;  %v303_v7 = vld [vmem:[#allocation5 + $0x170] sm:$0xff]  ;;  %v270_v10 = vld [vmem:[#allocation5 + $0x68] sm:$0xff]  ;;  %s1609_s7 = scalar_lea.vmem %s1090_s30, 128  ;;  %s1699_s10 = smov [#allocation7]  }
  0x41   : > { %1236 = vmatpush3.msra.mxu1 %v304_v3  ;;  %1202 = vmatprep.subr.mxu0 %v287_v4  ;;  %v302_v11 = vld [vmem:[#allocation5 + $0x168] sm:$0xff]  ;;  %v285_v12 = vld [vmem:[#allocation5 + $0xe0] sm:$0xff]  ;;  %v284_v16 = vld [vmem:[#allocation5 + $0xd8] sm:$0xff]  ;;  %p1610_p1 = scmp.ne.s32.totalorder %s1090_s30, %s1609_s7  ;;  %s1613_s25 = sshll.u32 %s1699_s10, 4  ;;  %s1614_s25 = int_to_ptr.vmem [resolvable:$false] %s1613_s25 }
  0x42   : > { %1237 = vmatprep.subr.mxu1 %v319_v5  ;;  %1203 = vmatpush3.msra.mxu0 %v271_v6  ;;  %v317_v13 = vld [vmem:[#allocation5 + $0x1e0] sm:$0xff]  ;;  %v316_v17 = vld [vmem:[#allocation5 + $0x1d8] sm:$0xff]  ;;  %v283_v20 = vld [vmem:[#allocation5 + $0xd0] sm:$0xff]  ;;  %s1615_s15 = scalar_lea.vmem %s1614_s25, 256  ;;  %p1616_p0 = scmp.lt.s32.totalorder %s1090_s30, %s1614_s25 }
  0x43   : > { %1238 = vmatpush3.msra.mxu1 %v303_v7  ;;  %1204 = vmatprep.subr.mxu0 %v286_v8  ;;  %v269_v14 = vld [vmem:[#allocation5 + $0x60] sm:$0xff]  ;;  %v268_v18 = vld [vmem:[#allocation5 + $0x58] sm:$0xff]  ;;  %v315_v21 = vld [vmem:[#allocation5 + $0x1d0] sm:$0xff]  ;;  %p1611_p8 = pnand %p1610_p1, %p1807_p13  ;;  %p1617_p2 = scmp.lt.s32.totalorder %s1615_s15, %s1609_s7 }
  0x44   : > { %1239 = vmatprep.subr.mxu1 %v318_v9  ;;  %v301_v15 = vld [vmem:[#allocation5 + $0x160] sm:$0xff]  ;;  %1205 = vmatpush3.msra.mxu0 %v270_v10  ;;  %v300_v19 = vld [vmem:[#allocation5 + $0x158] sm:$0xff]  ;;  %v267_v22 = vld [vmem:[#allocation5 + $0x50] sm:$0xff] }
  0x45   : > { %1240 = vmatpush3.msra.mxu1 %v302_v11  ;;  %1206 = vmatprep.subr.mxu0 %v285_v12  ;;  %v299_v23 = vld [vmem:[#allocation5 + $0x150] sm:$0xff]  ;;  %v282_v24 = vld [vmem:[#allocation5 + $0xc8] sm:$0xff]  ;;  %v281_v28 = vld [vmem:[#allocation5 + $0xc0] sm:$0xff]  ;;  %p1612_p10 = pneg %p1611_p8  ;;  %p1618_p3 = por %p1617_p2, %p1616_p0 }
  0x46   : > { %1241 = vmatprep.subr.mxu1 %v317_v13  ;;  %1207 = vmatpush3.msra.mxu0 %v269_v14  ;;  %v314_v25 = vld [vmem:[#allocation5 + $0x1c8] sm:$0xff]  ;;  %v313_v29 = vld [vmem:[#allocation5 + $0x1c0] sm:$0xff]  ;;  %v280_v32 = vld [vmem:[#allocation5 + $0xb8] sm:$0xff] }
  0x47   : > { %1242 = vmatpush3.msra.mxu1 %v301_v15  ;;  %1208 = vmatprep.subr.mxu0 %v284_v16  ;;  %v266_v26 = vld [vmem:[#allocation5 + $0x48] sm:$0xff]  ;;  %v265_v30 = vld [vmem:[#allocation5 + $0x40] sm:$0xff]  ;;  %v312_v33 = vld [vmem:[#allocation5 + $0x1b8] sm:$0xff]  ;;  %p1619_p5 = pnand %p1618_p3, %p1612_p10 }
  0x48   : > { %1243 = vmatprep.subr.mxu1 %v316_v17  ;;  %1209 = vmatpush3.msra.mxu0 %v268_v18  ;;  %v298_v27 = vld [vmem:[#allocation5 + $0x148] sm:$0xff]  ;;  %v297_v31 = vld [vmem:[#allocation5 + $0x140] sm:$0xff]  ;;  %v264_v34 = vld [vmem:[#allocation5 + $0x38] sm:$0xff] }
  0x49   : > { %1244 = vmatpush3.msra.mxu1 %v300_v19  ;;  %1210 = vmatprep.subr.mxu0 %v283_v20  ;;  %v296_v35 = vld [vmem:[#allocation5 + $0x138] sm:$0xff]  ;;  %v279_v36 = vld [vmem:[#allocation5 + $0xb0] sm:$0xff]  ;;  %v278_v40 = vld [vmem:[#allocation5 + $0xa8] sm:$0xff] }
  0x4a   : > { %1245 = vmatprep.subr.mxu1 %v315_v21  ;;  %1211 = vmatpush3.msra.mxu0 %v267_v22  ;;  %v311_v37 = vld [vmem:[#allocation5 + $0x1b0] sm:$0xff]  ;;  %v310_v41 = vld [vmem:[#allocation5 + $0x1a8] sm:$0xff]  ;;  %v277_v44 = vld [vmem:[#allocation5 + $0xa0] sm:$0xff] }
  0x4b   : > { %1246 = vmatpush3.msra.mxu1 %v299_v23  ;;  %1212 = vmatprep.subr.mxu0 %v282_v24  ;;  %v263_v38 = vld [vmem:[#allocation5 + $0x30] sm:$0xff]  ;;  %v262_v42 = vld [vmem:[#allocation5 + $0x28] sm:$0xff]  ;;  %v309_v45 = vld [vmem:[#allocation5 + $0x1a0] sm:$0xff] }
  0x4c   : > { %1247 = vmatprep.subr.mxu1 %v314_v25  ;;  %1213 = vmatpush3.msra.mxu0 %v266_v26  ;;  %v295_v39 = vld [vmem:[#allocation5 + $0x130] sm:$0xff]  ;;  %v294_v43 = vld [vmem:[#allocation5 + $0x128] sm:$0xff]  ;;  %v261_v46 = vld [vmem:[#allocation5 + $0x20] sm:$0xff] }
  0x4d   : > { %1248 = vmatpush3.msra.mxu1 %v298_v27  ;;  %1214 = vmatprep.subr.mxu0 %v281_v28  ;;  %v293_v47 = vld [vmem:[#allocation5 + $0x120] sm:$0xff]  ;;  %v276_v48 = vld [vmem:[#allocation5 + $0x98] sm:$0xff]  ;;  %v275_v52 = vld [vmem:[#allocation5 + $0x90] sm:$0xff] }
  0x4e   : > { %1249 = vmatprep.subr.mxu1 %v313_v29  ;;  %1215 = vmatpush3.msra.mxu0 %v265_v30  ;;  %v308_v49 = vld [vmem:[#allocation5 + $0x198] sm:$0xff]  ;;  %v307_v53 = vld [vmem:[#allocation5 + $0x190] sm:$0xff]  ;;  %v274_v56 = vld [vmem:[#allocation5 + $0x88] sm:$0xff] }
  0x4f   : > { %1250 = vmatpush3.msra.mxu1 %v297_v31  ;;  %1216 = vmatprep.subr.mxu0 %v280_v32  ;;  %v260_v50 = vld [vmem:[#allocation5 + $0x18] sm:$0xff]  ;;  %v259_v54 = vld [vmem:[#allocation5 + $0x10] sm:$0xff]  ;;  %v306_v57 = vld [vmem:[#allocation5 + $0x188] sm:$0xff] }
  0x50   : > { %1251 = vmatprep.subr.mxu1 %v312_v33  ;;  %1217 = vmatpush3.msra.mxu0 %v264_v34  ;;  %v292_v51 = vld [vmem:[#allocation5 + $0x118] sm:$0xff]  ;;  %v291_v55 = vld [vmem:[#allocation5 + $0x110] sm:$0xff]  ;;  %v258_v58 = vld [vmem:[#allocation5 + $0x8] sm:$0xff] }
  0x51   : > { %1252 = vmatpush3.msra.mxu1 %v296_v35  ;;  %1218 = vmatprep.subr.mxu0 %v279_v36  ;;  %v290_v59 = vld [vmem:[#allocation5 + $0x108] sm:$0xff]  ;;  %v273_v60 = vld [vmem:[#allocation5 + $0x80] sm:$0xff]  ;;  %v244_v1 = vld [vmem:[%s1839_s26 + $0x18] sm:$0xff] }
  0x52   : > { %1253 = vmatprep.subr.mxu1 %v311_v37  ;;  %1219 = vmatpush3.msra.mxu0 %v263_v38  ;;  %v305_v61 = vld [vmem:[#allocation5 + $0x180] sm:$0xff]  ;;  %v242_v63 = vld [vmem:[%s1839_s26 + $0x8] sm:$0xff]  ;;  %v243_v3 = vld [vmem:[%s1839_s26 + $0x10] sm:$0xff] }
  0x53   : > { %1254 = vmatpush3.msra.mxu1 %v295_v39  ;;  %1220 = vmatprep.subr.mxu0 %v278_v40  ;;  %v257_v62 = vld [vmem:[#allocation5] sm:$0xff]  ;;  %v352_v4 = vld [vmem:[#allocation5 + $0x2f8] sm:$0xff]  ;;  %v351_v8 = vld [vmem:[#allocation5 + $0x2f0] sm:$0xff] }
  0x54   : > { %1255 = vmatprep.subr.mxu1 %v310_v41  ;;  %1221 = vmatpush3.msra.mxu0 %v262_v42  ;;  %v289_v0 = vld [vmem:[#allocation5 + $0x100] sm:$0xff]  ;;  %v384_v5 = vld [vmem:[#allocation5 + $0x3f8] sm:$0xff]  ;;  %v383_v9 = vld [vmem:[#allocation5 + $0x3f0] sm:$0xff] }
  0x55   : > { %1256 = vmatpush3.msra.mxu1 %v294_v43  ;;  %1222 = vmatprep.subr.mxu0 %v277_v44  ;;  %v241_v2 = vld [vmem:[%s1839_s26] sm:$0xff]  ;;  %v336_v6 = vld [vmem:[#allocation5 + $0x278] sm:$0xff]  ;;  %v335_v10 = vld [vmem:[#allocation5 + $0x270] sm:$0xff] }
  0x56   : > { %1257 = vmatprep.subr.mxu1 %v309_v45  ;;  %1223 = vmatpush3.msra.mxu0 %v261_v46  ;;  %v368_v7 = vld [vmem:[#allocation5 + $0x378] sm:$0xff]  ;;  %v367_v11 = vld [vmem:[#allocation5 + $0x370] sm:$0xff]  ;;  %v350_v12 = vld [vmem:[#allocation5 + $0x2e8] sm:$0xff] }
  0x57   : > { %1258 = vmatpush3.msra.mxu1 %v293_v47  ;;  %1224 = vmatprep.subr.mxu0 %v276_v48  ;;  %v382_v13 = vld [vmem:[#allocation5 + $0x3e8] sm:$0xff]  ;;  %v349_v16 = vld [vmem:[#allocation5 + $0x2e0] sm:$0xff]  ;;  %v348_v20 = vld [vmem:[#allocation5 + $0x2d8] sm:$0xff] }
  0x58   : > { %1259 = vmatprep.subr.mxu1 %v308_v49  ;;  %1225 = vmatpush3.msra.mxu0 %v260_v50  ;;  %v334_v14 = vld [vmem:[#allocation5 + $0x268] sm:$0xff]  ;;  %v381_v17 = vld [vmem:[#allocation5 + $0x3e0] sm:$0xff]  ;;  %v380_v21 = vld [vmem:[#allocation5 + $0x3d8] sm:$0xff] }
  0x59   : > { %1260 = vmatpush3.msra.mxu1 %v292_v51  ;;  %1226 = vmatprep.subr.mxu0 %v275_v52  ;;  %v366_v15 = vld [vmem:[#allocation5 + $0x368] sm:$0xff]  ;;  %v333_v18 = vld [vmem:[#allocation5 + $0x260] sm:$0xff]  ;;  %v332_v22 = vld [vmem:[#allocation5 + $0x258] sm:$0xff] }
  0x5a   : > { %1261 = vmatprep.subr.mxu1 %v307_v53  ;;  %1227 = vmatpush3.msra.mxu0 %v259_v54  ;;  %v365_v19 = vld [vmem:[#allocation5 + $0x360] sm:$0xff]  ;;  %v364_v23 = vld [vmem:[#allocation5 + $0x358] sm:$0xff]  ;;  %v347_v24 = vld [vmem:[#allocation5 + $0x2d0] sm:$0xff] }
  0x5b   : > { %1262 = vmatpush3.msra.mxu1 %v291_v55  ;;  %1228 = vmatprep.subr.mxu0 %v274_v56  ;;  %v379_v25 = vld [vmem:[#allocation5 + $0x3d0] sm:$0xff]  ;;  %v346_v28 = vld [vmem:[#allocation5 + $0x2c8] sm:$0xff]  ;;  %v345_v32 = vld [vmem:[#allocation5 + $0x2c0] sm:$0xff] }
  0x5c   : > { %1263 = vmatprep.subr.mxu1 %v306_v57  ;;  %1229 = vmatpush3.msra.mxu0 %v258_v58  ;;  %v331_v26 = vld [vmem:[#allocation5 + $0x250] sm:$0xff]  ;;  %v378_v29 = vld [vmem:[#allocation5 + $0x3c8] sm:$0xff]  ;;  %v377_v33 = vld [vmem:[#allocation5 + $0x3c0] sm:$0xff] }
  0x5d   : > { %1264 = vmatpush3.msra.mxu1 %v290_v59  ;;  %1230 = vmatprep.subr.mxu0 %v273_v60  ;;  %v363_v27 = vld [vmem:[#allocation5 + $0x350] sm:$0xff]  ;;  %v330_v30 = vld [vmem:[#allocation5 + $0x248] sm:$0xff]  ;;  %v329_v34 = vld [vmem:[#allocation5 + $0x240] sm:$0xff] }
  0x5e   : > { %1265 = vmatprep.subr.mxu1 %v305_v61  ;;  %1231 = vmatpush3.msra.mxu0 %v257_v62  ;;  %v362_v31 = vld [vmem:[#allocation5 + $0x348] sm:$0xff]  ;;  %v361_v35 = vld [vmem:[#allocation5 + $0x340] sm:$0xff]  ;;  %v344_v36 = vld [vmem:[#allocation5 + $0x2b8] sm:$0xff] }
  0x5f   : > { %577 = vmatprep.mubr.f32.mxu0 %v242_v63  ;;  %1266 = vmatpush3.msra.mxu1 %v289_v0  ;;  %v376_v37 = vld [vmem:[#allocation5 + $0x3b8] sm:$0xff]  ;;  %v343_v40 = vld [vmem:[#allocation5 + $0x2b0] sm:$0xff]  ;;  %v342_v44 = vld [vmem:[#allocation5 + $0x2a8] sm:$0xff] }
  0x60   : > { %647 = vmatprep.mubr.f32.mxu1 %v244_v1  ;;  %578 = vmatmul.mubr.f32.vlgmr.msra.gmra.mxu0 %v241_v2  ;;  %v328_v38 = vld [vmem:[#allocation5 + $0x238] sm:$0xff]  ;;  %v375_v41 = vld [vmem:[#allocation5 + $0x3b0] sm:$0xff]  ;;  %v374_v45 = vld [vmem:[#allocation5 + $0x3a8] sm:$0xff] }
  0x61   : > { %648 = vmatmul.mubr.f32.vlgmr.msra.gmra.mxu1 %v243_v3  ;;  %1270 = vmatprep.subr.mxu0 %v352_v4  ;;  %v360_v39 = vld [vmem:[#allocation5 + $0x338] sm:$0xff]  ;;  %v327_v42 = vld [vmem:[#allocation5 + $0x230] sm:$0xff]  ;;  %v326_v46 = vld [vmem:[#allocation5 + $0x228] sm:$0xff] }
  0x62   : > { %1305 = vmatprep.subr.mxu1 %v384_v5  ;;  %1271 = vmatpush3.msra.mxu0 %v336_v6  ;;  %v359_v43 = vld [vmem:[#allocation5 + $0x330] sm:$0xff]  ;;  %v358_v47 = vld [vmem:[#allocation5 + $0x328] sm:$0xff]  ;;  %v341_v48 = vld [vmem:[#allocation5 + $0x2a0] sm:$0xff] }
  0x63   : > { %1306 = vmatpush3.msra.mxu1 %v368_v7  ;;  %1272 = vmatprep.subr.mxu0 %v351_v8  ;;  %v373_v49 = vld [vmem:[#allocation5 + $0x3a0] sm:$0xff]  ;;  %v340_v52 = vld [vmem:[#allocation5 + $0x298] sm:$0xff]  ;;  %v339_v56 = vld [vmem:[#allocation5 + $0x290] sm:$0xff] }
  0x64   : > { %1307 = vmatprep.subr.mxu1 %v383_v9  ;;  %1273 = vmatpush3.msra.mxu0 %v335_v10  ;;  %v325_v50 = vld [vmem:[#allocation5 + $0x220] sm:$0xff]  ;;  %v372_v53 = vld [vmem:[#allocation5 + $0x398] sm:$0xff]  ;;  %v371_v57 = vld [vmem:[#allocation5 + $0x390] sm:$0xff] }
  0x65   : > { %1308 = vmatpush3.msra.mxu1 %v367_v11  ;;  %1274 = vmatprep.subr.mxu0 %v350_v12  ;;  %v357_v51 = vld [vmem:[#allocation5 + $0x320] sm:$0xff]  ;;  %v324_v54 = vld [vmem:[#allocation5 + $0x218] sm:$0xff]  ;;  %v323_v58 = vld [vmem:[#allocation5 + $0x210] sm:$0xff] }
  0x66   : > { %1309 = vmatprep.subr.mxu1 %v382_v13  ;;  %1275 = vmatpush3.msra.mxu0 %v334_v14  ;;  %v356_v55 = vld [vmem:[#allocation5 + $0x318] sm:$0xff]  ;;  %v355_v59 = vld [vmem:[#allocation5 + $0x310] sm:$0xff]  ;;  %v338_v60 = vld [vmem:[#allocation5 + $0x288] sm:$0xff] }
  0x67   : > { %1310 = vmatpush3.msra.mxu1 %v366_v15  ;;  %1276 = vmatprep.subr.mxu0 %v349_v16  ;;  %v370_v61 = vld [vmem:[#allocation5 + $0x388] sm:$0xff]  ;;  %v337_v0 = vld [vmem:[#allocation5 + $0x280] sm:$0xff]  ;;  %v248_v6 = vld [vmem:[%s1839_s26 + $0x38] sm:$0xff] }
  0x68   : > { %1311 = vmatprep.subr.mxu1 %v381_v17  ;;  %1277 = vmatpush3.msra.mxu0 %v333_v18  ;;  %v322_v62 = vld [vmem:[#allocation5 + $0x208] sm:$0xff]  ;;  %v369_v1 = vld [vmem:[#allocation5 + $0x380] sm:$0xff]  ;;  %v416_v7 = vld [vmem:[#allocation5 + $0x4f8] sm:$0xff] }
  0x69   : > { %1312 = vmatpush3.msra.mxu1 %v365_v19  ;;  %1278 = vmatprep.subr.mxu0 %v348_v20  ;;  %v354_v63 = vld [vmem:[#allocation5 + $0x308] sm:$0xff]  ;;  %v321_v2 = vld [vmem:[#allocation5 + $0x200] sm:$0xff]  ;;  %v448_v8 = vld [vmem:[#allocation5 + $0x5f8] sm:$0xff] }
  0x6a   : > { %1313 = vmatprep.subr.mxu1 %v380_v21  ;;  %1279 = vmatpush3.msra.mxu0 %v332_v22  ;;  %v246_v3 = vld [vmem:[%s1839_s26 + $0x28] sm:$0xff]  ;;  %v353_v4 = vld [vmem:[#allocation5 + $0x300] sm:$0xff]  ;;  %v247_v9 = vld [vmem:[%s1839_s26 + $0x30] sm:$0xff] }
  0x6b   : > { %1314 = vmatpush3.msra.mxu1 %v364_v23  ;;  %1280 = vmatprep.subr.mxu0 %v347_v24  ;;  %v245_v5 = vld [vmem:[%s1839_s26 + $0x20] sm:$0xff]  ;;  %v400_v10 = vld [vmem:[#allocation5 + $0x478] sm:$0xff]  ;;  %v415_v12 = vld [vmem:[#allocation5 + $0x4f0] sm:$0xff] }
  0x6c   : > { %1315 = vmatprep.subr.mxu1 %v379_v25  ;;  %1281 = vmatpush3.msra.mxu0 %v331_v26  ;;  %v432_v11 = vld [vmem:[#allocation5 + $0x578] sm:$0xff]  ;;  %v447_v13 = vld [vmem:[#allocation5 + $0x5f0] sm:$0xff]  ;;  %v414_v16 = vld [vmem:[#allocation5 + $0x4e8] sm:$0xff] }
  0x6d   : > { %1316 = vmatpush3.msra.mxu1 %v363_v27  ;;  %1282 = vmatprep.subr.mxu0 %v346_v28  ;;  %v399_v14 = vld [vmem:[#allocation5 + $0x470] sm:$0xff]  ;;  %v446_v17 = vld [vmem:[#allocation5 + $0x5e8] sm:$0xff]  ;;  %v413_v20 = vld [vmem:[#allocation5 + $0x4e0] sm:$0xff] }
  0x6e   : > { %1317 = vmatprep.subr.mxu1 %v378_v29  ;;  %1283 = vmatpush3.msra.mxu0 %v330_v30  ;;  %v431_v15 = vld [vmem:[#allocation5 + $0x570] sm:$0xff]  ;;  %v398_v18 = vld [vmem:[#allocation5 + $0x468] sm:$0xff]  ;;  %v445_v21 = vld [vmem:[#allocation5 + $0x5e0] sm:$0xff] }
  0x6f   : > { %1318 = vmatpush3.msra.mxu1 %v362_v31  ;;  %1284 = vmatprep.subr.mxu0 %v345_v32  ;;  %v430_v19 = vld [vmem:[#allocation5 + $0x568] sm:$0xff]  ;;  %v397_v22 = vld [vmem:[#allocation5 + $0x460] sm:$0xff]  ;;  %v412_v24 = vld [vmem:[#allocation5 + $0x4d8] sm:$0xff] }
  0x70   : > { %1319 = vmatprep.subr.mxu1 %v377_v33  ;;  %1285 = vmatpush3.msra.mxu0 %v329_v34  ;;  %v429_v23 = vld [vmem:[#allocation5 + $0x560] sm:$0xff]  ;;  %v444_v25 = vld [vmem:[#allocation5 + $0x5d8] sm:$0xff]  ;;  %v411_v28 = vld [vmem:[#allocation5 + $0x4d0] sm:$0xff] }
  0x71   : > { %1320 = vmatpush3.msra.mxu1 %v361_v35  ;;  %1286 = vmatprep.subr.mxu0 %v344_v36  ;;  %v396_v26 = vld [vmem:[#allocation5 + $0x458] sm:$0xff]  ;;  %v443_v29 = vld [vmem:[#allocation5 + $0x5d0] sm:$0xff]  ;;  %v410_v32 = vld [vmem:[#allocation5 + $0x4c8] sm:$0xff] }
  0x72   : > { %1321 = vmatprep.subr.mxu1 %v376_v37  ;;  %1287 = vmatpush3.msra.mxu0 %v328_v38  ;;  %v428_v27 = vld [vmem:[#allocation5 + $0x558] sm:$0xff]  ;;  %v395_v30 = vld [vmem:[#allocation5 + $0x450] sm:$0xff]  ;;  %v442_v33 = vld [vmem:[#allocation5 + $0x5c8] sm:$0xff] }
  0x73   : > { %1322 = vmatpush3.msra.mxu1 %v360_v39  ;;  %1288 = vmatprep.subr.mxu0 %v343_v40  ;;  %v427_v31 = vld [vmem:[#allocation5 + $0x550] sm:$0xff]  ;;  %v394_v34 = vld [vmem:[#allocation5 + $0x448] sm:$0xff]  ;;  %v409_v36 = vld [vmem:[#allocation5 + $0x4c0] sm:$0xff] }
  0x74   : > { %1323 = vmatprep.subr.mxu1 %v375_v41  ;;  %1289 = vmatpush3.msra.mxu0 %v327_v42  ;;  %v426_v35 = vld [vmem:[#allocation5 + $0x548] sm:$0xff]  ;;  %v441_v37 = vld [vmem:[#allocation5 + $0x5c0] sm:$0xff]  ;;  %v408_v40 = vld [vmem:[#allocation5 + $0x4b8] sm:$0xff] }
  0x75   : > { %1324 = vmatpush3.msra.mxu1 %v359_v43  ;;  %1290 = vmatprep.subr.mxu0 %v342_v44  ;;  %v393_v38 = vld [vmem:[#allocation5 + $0x440] sm:$0xff]  ;;  %v440_v41 = vld [vmem:[#allocation5 + $0x5b8] sm:$0xff]  ;;  %v407_v44 = vld [vmem:[#allocation5 + $0x4b0] sm:$0xff] }
  0x76   : > { %1325 = vmatprep.subr.mxu1 %v374_v45  ;;  %1291 = vmatpush3.msra.mxu0 %v326_v46  ;;  %v425_v39 = vld [vmem:[#allocation5 + $0x540] sm:$0xff]  ;;  %v392_v42 = vld [vmem:[#allocation5 + $0x438] sm:$0xff]  ;;  %v439_v45 = vld [vmem:[#allocation5 + $0x5b0] sm:$0xff] }
  0x77   : > { %1326 = vmatpush3.msra.mxu1 %v358_v47  ;;  %1292 = vmatprep.subr.mxu0 %v341_v48  ;;  %v424_v43 = vld [vmem:[#allocation5 + $0x538] sm:$0xff]  ;;  %v391_v46 = vld [vmem:[#allocation5 + $0x430] sm:$0xff]  ;;  %v406_v48 = vld [vmem:[#allocation5 + $0x4a8] sm:$0xff] }
  0x78   : > { %1327 = vmatprep.subr.mxu1 %v373_v49  ;;  %1293 = vmatpush3.msra.mxu0 %v325_v50  ;;  %v423_v47 = vld [vmem:[#allocation5 + $0x530] sm:$0xff]  ;;  %v438_v49 = vld [vmem:[#allocation5 + $0x5a8] sm:$0xff] }
  0x79   : > { %1328 = vmatpush3.msra.mxu1 %v357_v51  ;;  %1294 = vmatprep.subr.mxu0 %v340_v52  ;;  %v390_v50 = vld [vmem:[#allocation5 + $0x428] sm:$0xff]  ;;  %v405_v52 = vld [vmem:[#allocation5 + $0x4a0] sm:$0xff] }
  0x7a   : > { %1329 = vmatprep.subr.mxu1 %v372_v53  ;;  %1295 = vmatpush3.msra.mxu0 %v324_v54  ;;  %v422_v51 = vld [vmem:[#allocation5 + $0x528] sm:$0xff]  ;;  %v437_v53 = vld [vmem:[#allocation5 + $0x5a0] sm:$0xff] }
  0x7b   : > { %1330 = vmatpush3.msra.mxu1 %v356_v55  ;;  %1296 = vmatprep.subr.mxu0 %v339_v56  ;;  %v389_v54 = vld [vmem:[#allocation5 + $0x420] sm:$0xff]  ;;  %v404_v56 = vld [vmem:[#allocation5 + $0x498] sm:$0xff] }
  0x7c   : > { %1331 = vmatprep.subr.mxu1 %v371_v57  ;;  %1297 = vmatpush3.msra.mxu0 %v323_v58  ;;  %v421_v55 = vld [vmem:[#allocation5 + $0x520] sm:$0xff]  ;;  %v436_v57 = vld [vmem:[#allocation5 + $0x598] sm:$0xff] }
  0x7d   : > { %1332 = vmatpush3.msra.mxu1 %v355_v59  ;;  %1298 = vmatprep.subr.mxu0 %v338_v60  ;;  %v388_v58 = vld [vmem:[#allocation5 + $0x418] sm:$0xff]  ;;  %v403_v60 = vld [vmem:[#allocation5 + $0x490] sm:$0xff] }
  0x7e   : > { %1333 = vmatprep.subr.mxu1 %v370_v61  ;;  %1299 = vmatpush3.msra.mxu0 %v322_v62  ;;  %v420_v59 = vld [vmem:[#allocation5 + $0x518] sm:$0xff]  ;;  %v435_v61 = vld [vmem:[#allocation5 + $0x590] sm:$0xff] }
  0x7f   : > { %1334 = vmatpush3.msra.mxu1 %v354_v63  ;;  %1300 = vmatprep.subr.mxu0 %v337_v0  ;;  %v387_v62 = vld [vmem:[#allocation5 + $0x410] sm:$0xff]  ;;  %v402_v0 = vld [vmem:[#allocation5 + $0x488] sm:$0xff] }
  0x80   : > { %1335 = vmatprep.subr.mxu1 %v369_v1  ;;  %1301 = vmatpush3.msra.mxu0 %v321_v2  ;;  %v419_v63 = vld [vmem:[#allocation5 + $0x510] sm:$0xff]  ;;  %v434_v1 = vld [vmem:[#allocation5 + $0x588] sm:$0xff] }
  0x81   : > { %717 = vmatprep.mubr.f32.mxu0 %v246_v3  ;;  %1336 = vmatpush3.msra.mxu1 %v353_v4  ;;  %v386_v2 = vld [vmem:[#allocation5 + $0x408] sm:$0xff]  ;;  %v401_v4 = vld [vmem:[#allocation5 + $0x480] sm:$0xff] }
  0x82   : > { %718 = vmatmul.mubr.f32.vlgmr.msra.gmra.mxu0 %v245_v5  ;;  %787 = vmatprep.mubr.f32.mxu1 %v248_v6  ;;  %v418_v3 = vld [vmem:[#allocation5 + $0x508] sm:$0xff]  ;;  %v433_v5 = vld [vmem:[#allocation5 + $0x580] sm:$0xff] }
  0x83   : > { %1340 = vmatprep.subr.mxu0 %v416_v7  ;;  %1375 = vmatprep.subr.mxu1 %v448_v8  ;;  %v385_v6 = vld [vmem:[#allocation5 + $0x400] sm:$0xff]  ;;  %v250_v7 = vld [vmem:[%s1839_s26 + $0x48] sm:$0xff] }
  0x84   : > { %788 = vmatmul.mubr.f32.vlgmr.msra.gmra.mxu1 %v247_v9  ;;  %1341 = vmatpush3.msra.mxu0 %v400_v10  ;;  %v417_v8 = vld [vmem:[#allocation5 + $0x500] sm:$0xff]  ;;  %v252_v10 = vld [vmem:[%s1839_s26 + $0x58] sm:$0xff] }
  0x85   : > { %1376 = vmatpush3.msra.mxu1 %v432_v11  ;;  %1342 = vmatprep.subr.mxu0 %v415_v12  ;;  %v249_v9 = vld [vmem:[%s1839_s26 + $0x40] sm:$0xff]  ;;  %v480_v11 = vld [vmem:[#allocation5 + $0x6f8] sm:$0xff] }
  0x86   : > { %1377 = vmatprep.subr.mxu1 %v447_v13  ;;  %1343 = vmatpush3.msra.mxu0 %v399_v14  ;;  %v512_v12 = vld [vmem:[#allocation5 + $0x7f8] sm:$0xff]  ;;  %v251_v13 = vld [vmem:[%s1839_s26 + $0x50] sm:$0xff] }
  0x87   : > { %1378 = vmatpush3.msra.mxu1 %v431_v15  ;;  %1344 = vmatprep.subr.mxu0 %v414_v16  ;;  %v464_v14 = vld [vmem:[#allocation5 + $0x678] sm:$0xff]  ;;  %v479_v16 = vld [vmem:[#allocation5 + $0x6f0] sm:$0xff] }
  0x88   : > { %1379 = vmatprep.subr.mxu1 %v446_v17  ;;  %1345 = vmatpush3.msra.mxu0 %v398_v18  ;;  %v496_v15 = vld [vmem:[#allocation5 + $0x778] sm:$0xff]  ;;  %v511_v17 = vld [vmem:[#allocation5 + $0x7f0] sm:$0xff] }
  0x89   : > { %1380 = vmatpush3.msra.mxu1 %v430_v19  ;;  %1346 = vmatprep.subr.mxu0 %v413_v20  ;;  %v463_v18 = vld [vmem:[#allocation5 + $0x670] sm:$0xff]  ;;  %v478_v20 = vld [vmem:[#allocation5 + $0x6e8] sm:$0xff] }
  0x8a   : > { %1381 = vmatprep.subr.mxu1 %v445_v21  ;;  %1347 = vmatpush3.msra.mxu0 %v397_v22  ;;  %v495_v19 = vld [vmem:[#allocation5 + $0x770] sm:$0xff]  ;;  %v510_v21 = vld [vmem:[#allocation5 + $0x7e8] sm:$0xff] }
  0x8b   : > { %1382 = vmatpush3.msra.mxu1 %v429_v23  ;;  %1348 = vmatprep.subr.mxu0 %v412_v24  ;;  %v462_v22 = vld [vmem:[#allocation5 + $0x668] sm:$0xff]  ;;  %v477_v24 = vld [vmem:[#allocation5 + $0x6e0] sm:$0xff] }
  0x8c   : > { %1383 = vmatprep.subr.mxu1 %v444_v25  ;;  %1349 = vmatpush3.msra.mxu0 %v396_v26  ;;  %v494_v23 = vld [vmem:[#allocation5 + $0x768] sm:$0xff]  ;;  %v509_v25 = vld [vmem:[#allocation5 + $0x7e0] sm:$0xff] }
  0x8d   : > { %1384 = vmatpush3.msra.mxu1 %v428_v27  ;;  %1350 = vmatprep.subr.mxu0 %v411_v28  ;;  %v461_v26 = vld [vmem:[#allocation5 + $0x660] sm:$0xff]  ;;  %v476_v28 = vld [vmem:[#allocation5 + $0x6d8] sm:$0xff] }
  0x8e   : > { %1385 = vmatprep.subr.mxu1 %v443_v29  ;;  %1351 = vmatpush3.msra.mxu0 %v395_v30  ;;  %v493_v27 = vld [vmem:[#allocation5 + $0x760] sm:$0xff]  ;;  %v508_v29 = vld [vmem:[#allocation5 + $0x7d8] sm:$0xff] }
  0x8f   : > { %1386 = vmatpush3.msra.mxu1 %v427_v31  ;;  %1352 = vmatprep.subr.mxu0 %v410_v32  ;;  %v460_v30 = vld [vmem:[#allocation5 + $0x658] sm:$0xff]  ;;  %v475_v32 = vld [vmem:[#allocation5 + $0x6d0] sm:$0xff] }
  0x90   : > { %1387 = vmatprep.subr.mxu1 %v442_v33  ;;  %1353 = vmatpush3.msra.mxu0 %v394_v34  ;;  %v492_v31 = vld [vmem:[#allocation5 + $0x758] sm:$0xff]  ;;  %v507_v33 = vld [vmem:[#allocation5 + $0x7d0] sm:$0xff] }
  0x91   : > { %1388 = vmatpush3.msra.mxu1 %v426_v35  ;;  %1354 = vmatprep.subr.mxu0 %v409_v36  ;;  %v459_v34 = vld [vmem:[#allocation5 + $0x650] sm:$0xff]  ;;  %v474_v36 = vld [vmem:[#allocation5 + $0x6c8] sm:$0xff] }
  0x92   : > { %1389 = vmatprep.subr.mxu1 %v441_v37  ;;  %1355 = vmatpush3.msra.mxu0 %v393_v38  ;;  %v491_v35 = vld [vmem:[#allocation5 + $0x750] sm:$0xff]  ;;  %v506_v37 = vld [vmem:[#allocation5 + $0x7c8] sm:$0xff] }
  0x93   : > { %1390 = vmatpush3.msra.mxu1 %v425_v39  ;;  %1356 = vmatprep.subr.mxu0 %v408_v40  ;;  %v458_v38 = vld [vmem:[#allocation5 + $0x648] sm:$0xff]  ;;  %v473_v40 = vld [vmem:[#allocation5 + $0x6c0] sm:$0xff] }
  0x94   : > { %1391 = vmatprep.subr.mxu1 %v440_v41  ;;  %1357 = vmatpush3.msra.mxu0 %v392_v42  ;;  %v490_v39 = vld [vmem:[#allocation5 + $0x748] sm:$0xff]  ;;  %v505_v41 = vld [vmem:[#allocation5 + $0x7c0] sm:$0xff] }
  0x95   : > { %1392 = vmatpush3.msra.mxu1 %v424_v43  ;;  %1358 = vmatprep.subr.mxu0 %v407_v44  ;;  %v457_v42 = vld [vmem:[#allocation5 + $0x640] sm:$0xff]  ;;  %v472_v44 = vld [vmem:[#allocation5 + $0x6b8] sm:$0xff] }
  0x96   : > { %1393 = vmatprep.subr.mxu1 %v439_v45  ;;  %1359 = vmatpush3.msra.mxu0 %v391_v46  ;;  %v489_v43 = vld [vmem:[#allocation5 + $0x740] sm:$0xff]  ;;  %v504_v45 = vld [vmem:[#allocation5 + $0x7b8] sm:$0xff] }
  0x97   : > { %1394 = vmatpush3.msra.mxu1 %v423_v47  ;;  %1360 = vmatprep.subr.mxu0 %v406_v48  ;;  %v456_v46 = vld [vmem:[#allocation5 + $0x638] sm:$0xff]  ;;  %v471_v48 = vld [vmem:[#allocation5 + $0x6b0] sm:$0xff] }
  0x98   : > { %1395 = vmatprep.subr.mxu1 %v438_v49  ;;  %1361 = vmatpush3.msra.mxu0 %v390_v50  ;;  %v488_v47 = vld [vmem:[#allocation5 + $0x738] sm:$0xff]  ;;  %v503_v49 = vld [vmem:[#allocation5 + $0x7b0] sm:$0xff] }
  0x99   : > { %1396 = vmatpush3.msra.mxu1 %v422_v51  ;;  %1362 = vmatprep.subr.mxu0 %v405_v52  ;;  %v455_v50 = vld [vmem:[#allocation5 + $0x630] sm:$0xff]  ;;  %v470_v52 = vld [vmem:[#allocation5 + $0x6a8] sm:$0xff] }
  0x9a   : > { %1397 = vmatprep.subr.mxu1 %v437_v53  ;;  %1363 = vmatpush3.msra.mxu0 %v389_v54  ;;  %v487_v51 = vld [vmem:[#allocation5 + $0x730] sm:$0xff]  ;;  %v502_v53 = vld [vmem:[#allocation5 + $0x7a8] sm:$0xff] }
  0x9b   : > { %1398 = vmatpush3.msra.mxu1 %v421_v55  ;;  %1364 = vmatprep.subr.mxu0 %v404_v56  ;;  %v454_v54 = vld [vmem:[#allocation5 + $0x628] sm:$0xff]  ;;  %v469_v56 = vld [vmem:[#allocation5 + $0x6a0] sm:$0xff] }
  0x9c   : > { %1399 = vmatprep.subr.mxu1 %v436_v57  ;;  %1365 = vmatpush3.msra.mxu0 %v388_v58  ;;  %v486_v55 = vld [vmem:[#allocation5 + $0x728] sm:$0xff]  ;;  %v501_v57 = vld [vmem:[#allocation5 + $0x7a0] sm:$0xff] }
  0x9d   : > { %1400 = vmatpush3.msra.mxu1 %v420_v59  ;;  %1366 = vmatprep.subr.mxu0 %v403_v60  ;;  %v453_v58 = vld [vmem:[#allocation5 + $0x620] sm:$0xff]  ;;  %v468_v60 = vld [vmem:[#allocation5 + $0x698] sm:$0xff] }
  0x9e   : > { %1401 = vmatprep.subr.mxu1 %v435_v61  ;;  %1367 = vmatpush3.msra.mxu0 %v387_v62  ;;  %v485_v59 = vld [vmem:[#allocation5 + $0x720] sm:$0xff]  ;;  %v500_v61 = vld [vmem:[#allocation5 + $0x798] sm:$0xff] }
  0x9f   : > { %1402 = vmatpush3.msra.mxu1 %v419_v63  ;;  %1368 = vmatprep.subr.mxu0 %v402_v0  ;;  %v452_v62 = vld [vmem:[#allocation5 + $0x618] sm:$0xff]  ;;  %v467_v0 = vld [vmem:[#allocation5 + $0x690] sm:$0xff] }
  0xa0   : > { %1403 = vmatprep.subr.mxu1 %v434_v1  ;;  %1369 = vmatpush3.msra.mxu0 %v386_v2  ;;  %v484_v63 = vld [vmem:[#allocation5 + $0x718] sm:$0xff]  ;;  %v499_v1 = vld [vmem:[#allocation5 + $0x790] sm:$0xff] }
  0xa1   : > { %1404 = vmatpush3.msra.mxu1 %v418_v3  ;;  %1370 = vmatprep.subr.mxu0 %v401_v4  ;;  %v451_v2 = vld [vmem:[#allocation5 + $0x610] sm:$0xff]  ;;  %v466_v4 = vld [vmem:[#allocation5 + $0x688] sm:$0xff] }
  0xa2   : > { %1405 = vmatprep.subr.mxu1 %v433_v5  ;;  %1371 = vmatpush3.msra.mxu0 %v385_v6  ;;  %v483_v3 = vld [vmem:[#allocation5 + $0x710] sm:$0xff]  ;;  %v498_v5 = vld [vmem:[#allocation5 + $0x788] sm:$0xff] }
  0xa3   : > { %857 = vmatprep.mubr.f32.mxu0 %v250_v7  ;;  %1406 = vmatpush3.msra.mxu1 %v417_v8  ;;  %v450_v6 = vld [vmem:[#allocation5 + $0x608] sm:$0xff]  ;;  %v465_v8 = vld [vmem:[#allocation5 + $0x680] sm:$0xff] }
  0xa4   : > { %858 = vmatmul.mubr.f32.vlgmr.msra.gmra.mxu0 %v249_v9  ;;  %927 = vmatprep.mubr.f32.mxu1 %v252_v10  ;;  %v482_v7 = vld [vmem:[#allocation5 + $0x708] sm:$0xff]  ;;  %v497_v9 = vld [vmem:[#allocation5 + $0x780] sm:$0xff] }
  0xa5   : > { %1410 = vmatprep.subr.mxu0 %v480_v11  ;;  %1445 = vmatprep.subr.mxu1 %v512_v12  ;;  %v449_v10 = vld [vmem:[#allocation5 + $0x600] sm:$0xff]  ;;  %v254_v11 = vld [vmem:[%s1839_s26 + $0x68] sm:$0xff] }
  0xa6   : > { %928 = vmatmul.mubr.f32.vlgmr.msra.gmra.mxu1 %v251_v13  ;;  %1411 = vmatpush3.msra.mxu0 %v464_v14  ;;  %v481_v12 = vld [vmem:[#allocation5 + $0x700] sm:$0xff]  ;;  %v256_v13 = vld [vmem:[%s1839_s26 + $0x78] sm:$0xff] }
  0xa7   : > { %1446 = vmatpush3.msra.mxu1 %v496_v15  ;;  %1412 = vmatprep.subr.mxu0 %v479_v16  ;;  %v253_v14 = vld [vmem:[%s1839_s26 + $0x60] sm:$0xff]  ;;  %v255_v15 = vld [vmem:[%s1839_s26 + $0x70] sm:$0xff] }
  0xa8   : > { %1447 = vmatprep.subr.mxu1 %v511_v17  ;;  %1413 = vmatpush3.msra.mxu0 %v463_v18 }
  0xa9   : > { %1448 = vmatpush3.msra.mxu1 %v495_v19  ;;  %1414 = vmatprep.subr.mxu0 %v478_v20 }
  0xaa   : > { %1449 = vmatprep.subr.mxu1 %v510_v21  ;;  %1415 = vmatpush3.msra.mxu0 %v462_v22 }
  0xab   : > { %1450 = vmatpush3.msra.mxu1 %v494_v23  ;;  %1416 = vmatprep.subr.mxu0 %v477_v24 }
  0xac   : > { %1451 = vmatprep.subr.mxu1 %v509_v25  ;;  %1417 = vmatpush3.msra.mxu0 %v461_v26 }
  0xad   : > { %1452 = vmatpush3.msra.mxu1 %v493_v27  ;;  %1418 = vmatprep.subr.mxu0 %v476_v28 }
  0xae   : > { %1453 = vmatprep.subr.mxu1 %v508_v29  ;;  %1419 = vmatpush3.msra.mxu0 %v460_v30 }
  0xaf   : > { %1454 = vmatpush3.msra.mxu1 %v492_v31  ;;  %1420 = vmatprep.subr.mxu0 %v475_v32 }
  0xb0   : > { %1455 = vmatprep.subr.mxu1 %v507_v33  ;;  %1421 = vmatpush3.msra.mxu0 %v459_v34 }
  0xb1   : > { %1456 = vmatpush3.msra.mxu1 %v491_v35  ;;  %1422 = vmatprep.subr.mxu0 %v474_v36 }
  0xb2   : > { %1457 = vmatprep.subr.mxu1 %v506_v37  ;;  %1423 = vmatpush3.msra.mxu0 %v458_v38 }
  0xb3   : > { %1458 = vmatpush3.msra.mxu1 %v490_v39  ;;  %1424 = vmatprep.subr.mxu0 %v473_v40 }
  0xb4   : > { %1459 = vmatprep.subr.mxu1 %v505_v41  ;;  %1425 = vmatpush3.msra.mxu0 %v457_v42 }
  0xb5   : > { %1460 = vmatpush3.msra.mxu1 %v489_v43  ;;  %1426 = vmatprep.subr.mxu0 %v472_v44 }
  0xb6   : > { %1461 = vmatprep.subr.mxu1 %v504_v45  ;;  %1427 = vmatpush3.msra.mxu0 %v456_v46  ;;  %v1194_v46 = vld [vmem:[%s1911_s2] ss:$0 sm:$0xff] }
  0xb7   : > { %1462 = vmatpush3.msra.mxu1 %v488_v47  ;;  %1428 = vmatprep.subr.mxu0 %v471_v48 }
  0xb8   : > { %1463 = vmatprep.subr.mxu1 %v503_v49  ;;  %1429 = vmatpush3.msra.mxu0 %v455_v50 }
  0xb9   : > { %1464 = vmatpush3.msra.mxu1 %v487_v51  ;;  %1430 = vmatprep.subr.mxu0 %v470_v52 }
  0xba   : > { %1465 = vmatprep.subr.mxu1 %v502_v53  ;;  %1431 = vmatpush3.msra.mxu0 %v454_v54 }
  0xbb   : > { %1466 = vmatpush3.msra.mxu1 %v486_v55  ;;  %1432 = vmatprep.subr.mxu0 %v469_v56 }
  0xbc   : > { %1467 = vmatprep.subr.mxu1 %v501_v57  ;;  %1433 = vmatpush3.msra.mxu0 %v453_v58 }
  0xbd   : > { %1468 = vmatpush3.msra.mxu1 %v485_v59  ;;  %1434 = vmatprep.subr.mxu0 %v468_v60 }
  0xbe   : > { %1469 = vmatprep.subr.mxu1 %v500_v61  ;;  %1435 = vmatpush3.msra.mxu0 %v452_v62 }
  0xbf   : > { %1470 = vmatpush3.msra.mxu1 %v484_v63  ;;  %1436 = vmatprep.subr.mxu0 %v467_v0 }
  0xc0   : > { %1471 = vmatprep.subr.mxu1 %v499_v1  ;;  %1437 = vmatpush3.msra.mxu0 %v451_v2 }
  0xc1   : > { %1472 = vmatpush3.msra.mxu1 %v483_v3  ;;  %1438 = vmatprep.subr.mxu0 %v466_v4 }
  0xc2   : > { %1473 = vmatprep.subr.mxu1 %v498_v5  ;;  %1439 = vmatpush3.msra.mxu0 %v450_v6 }
  0xc3   : > { %1474 = vmatpush3.msra.mxu1 %v482_v7  ;;  %1440 = vmatprep.subr.mxu0 %v465_v8 }
  0xc4   : > { %1475 = vmatprep.subr.mxu1 %v497_v9  ;;  %1441 = vmatpush3.msra.mxu0 %v449_v10 }
  0xc5   : > { %997 = vmatprep.mubr.f32.mxu0 %v254_v11  ;;  %1476 = vmatpush3.msra.mxu1 %v481_v12 }
  0xc6   : > { %1067 = vmatprep.mubr.f32.mxu1 %v256_v13  ;;  %998 = vmatmul.mubr.f32.vlgmr.msra.gmra.mxu0 %v253_v14 }
  0xc7   : > { %1068 = vmatmul.mubr.f32.vlgmr.msra.gmra.mxu1 %v255_v15 }
 0x120   : > { %v1232_v16 = vpop.f32.mrf.mxu0 }
 0x121   : > { %v1267_v17 = vpop.f32.mrf.mxu1 }
 0x122   : > { %v1233_v18 = vpop.f32.mrf.mxu0 }
 0x123   : > { %v1268_v20 = vpop.f32.mrf.mxu1  ;;  %v1234_v23 = vadd.f32 %v1233_v18, %v1232_v16 }
 0x124   : > { %v1269_v24 = vadd.f32 %v1268_v20, %v1267_v17 }
 0x126   : > { %v650_v28 = vadd.f32 %v1269_v24, %v1234_v23 }
 0x142   : > { %v1302_v19 = vpop.f32.mrf.mxu0 }
 0x144   : > { %v1337_v21 = vpop.f32.mrf.mxu1  ;;  %v1303_v22 = vpop.f32.mrf.mxu0 }
 0x145   : > { %v1304_v26 = vadd.f32 %v1303_v22, %v1302_v19 }
 0x146   : > { %v1338_v27 = vpop.f32.mrf.mxu1 }
 0x147   : > { %v720_v31 = vadd.f32 %v1304_v26, %v650_v28  ;;  %v1339_v32 = vadd.f32 %v1338_v27, %v1337_v21 }
 0x149   : > { %v790_v35 = vadd.f32 %v1339_v32, %v720_v31 }
 0x164   : > { %v1372_v25 = vpop.f32.mrf.mxu0 }
 0x166   : > { %v1407_v29 = vpop.f32.mrf.mxu1  ;;  %v1373_v30 = vpop.f32.mrf.mxu0 }
 0x167   : > { %v1374_v33 = vadd.f32 %v1373_v30, %v1372_v25 }
 0x168   : > { %v1408_v34 = vpop.f32.mrf.mxu1 }
 0x169   : > { %v860_v36 = vadd.f32 %v1374_v33, %v790_v35  ;;  %v1409_v37 = vadd.f32 %v1408_v34, %v1407_v29 }
 0x16b   : > { %v930_v42 = vadd.f32 %v1409_v37, %v860_v36 }
 0x186   : > { %v1442_v38 = vpop.f32.mrf.mxu0 }
 0x187   : > { %v1477_v39 = vpop.f32.mrf.mxu1 }
 0x188   : > { %v1443_v40 = vpop.f32.mrf.mxu0 }
 0x189   : > { %v1478_v41 = vpop.f32.mrf.mxu1  ;;  %v1444_v43 = vadd.f32 %v1443_v40, %v1442_v38 }
 0x18a   : > { %v1479_v45 = vadd.f32 %v1478_v41, %v1477_v39 }
 0x18b   : > { %v1000_v44 = vadd.f32 %v1444_v43, %v930_v42 }
 0x18d   : > { %v1070_v47 = vadd.f32 %v1479_v45, %v1000_v44 }
 0x18f   : > { %v1073_v48 = vadd.f32 %v1194_v46, %v1070_v47 }
 0x191   : > { %1074 = vst [vmem:[%s225_s29] sm:$0xff] %v1073_v48 }
 0x192   : > { %1622 = shalt.err (!%p1619_p5)
}
 0x193   : > { %s1623_s11 = scalar_lea.hbm %s1087_s5, 128  ;;  %s1627_s26 = scalar_lea.hbm %s1912_s3, 256 }
 0x194   : > { %p1624_p7 = scmp.ne.s32.totalorder %s1087_s5, %s1623_s11  ;;  %p1628_p9 = scmp.lt.s32.totalorder %s1087_s5, %s1912_s3 }
 0x195   : > { %p1629_p11 = scmp.lt.s32.totalorder %s1627_s26, %s1623_s11 }
 0x196   : > { %p1625_p6 = pnand %p1624_p7, %p1807_p13 }
 0x197   : > { %p1630_p12 = por %p1629_p11, %p1628_p9 }
 0x198   : > { %p1626_p4 = pneg %p1625_p6 }
 0x19a   : > { %p1631_p1 = pnand %p1630_p12, %p1626_p4 }
 0x19c   : > { %1634 = shalt.err (!%p1631_p1)
}
 0x19d   : > { %1486 = dma.vmem_to_hbm [thread:$0]  (%p1807_p13), %s1090_s30, 128, %s1087_s5, %s1076_s6  }
 0x19e PF: > { %s1101_s24 = sand.u32 1, %s1673_s12   ;;  %p1924_p8 = scmp.ne.s32.totalorder %s1917_s23, 0 }
 0x19f   : > { %p1925_p10 = scmp.ge.s32.totalorder %s1693_s17, 2  ;;  %s1102_s27 = scalar_lea.sflag [#allocation4], %s1101_s24 }
 0x1a1   : > { %p1497_p0 = pnand %p1925_p10, %p1924_p8 }
 0x1a3   : > { %p1498_p2 = pneg %p1497_p0 }
 0x1a5   : > { %1668 = dma.done.wait (%p1498_p2), %s1102_s27, 128  }
 0x1a6   : > { %1670 = vsyncadd (%p1498_p2), %s1102_s27, 4294967168  ;;  %s20_s17 = sadd.s32 1, %s1693_s17   ;;  %s1926_s12 = smov %s1677_s13 }
 0x1a7   : > { %p17_p3 = scmp.ge.s32.totalorder %s20_s17, 4   ;;  %s1927_s13 = smov %s1681_s14 }
 0x1a8   : > { %s1928_s14 = smov %s1816_s19  ;;  %s1929_s15 = smov %s1689_s16 }
 0x1a9   : > { %s1930_s16 = smov %s1932_s28  ;;  %19 = sbr.rel (!%p17_p3) target bundleno = 7 (0x7), region = 86 }
 0x1ae   :  { %1107 = vsyncpa [#allocation3], 1 }
 0x1af   :  { %1109 = vsyncpa [#allocation3 + $0x1], 1 }
 0x1b0   :  { %1110 = vsyncpa [#allocation6], 1 }
 0x1b1   :  { %1111 = vsyncpa [#allocation4], 1 }
 0x1b2   :  { %1113 = vsyncpa [#allocation4 + $0x1], 1 }

</bundles_post_ra>
